<compile_context>
chip_gen: v5e
topology: v5e:2x2
jax: 0.10.0
libtpu: 0.0.40
codegen_flags: <defaults>
</compile_context>

<pallas_src>
import functools

import jax
import jax.numpy as jnp
from jax.experimental import pallas as pl
from jax.experimental.pallas import tpu as pltpu


def _round_up(x, m):
    return (x + m - 1) // m * m


def _mlp_kernel(t_ref, c_ref, w1_ref, b1_ref, w2_ref, b2_ref,
                w3_ref, b3_ref, w4_ref, b4_ref, o_ref):
    t = t_ref[...]                    # [1, Bt]  f32  (treatment^T)
    c = c_ref[...]                    # [2, Bt]  f32  (covariate^T)
    w1 = w1_ref[...]                  # [128, 3] f32

    # Layer 1: Linear(3, 128) + ReLU.  K = 3, so do it on the VPU as three
    # broadcast FMAs (concat of [treatment, covariate] folded in here).
    h = (w1[:, 0:1] * t
         + w1[:, 1:2] * c[0:1, :]
         + w1[:, 2:3] * c[1:2, :]
         + b1_ref[...])               # [128, Bt] f32
    h = jnp.maximum(h, 0.0)

    # Layer 2: Linear(128, 64) + ReLU on the MXU (bf16 inputs, f32 accum).
    h = jnp.dot(w2_ref[...], h.astype(jnp.bfloat16),
                preferred_element_type=jnp.float32) + b2_ref[...]
    h = jnp.maximum(h, 0.0)           # [64, Bt] f32

    # Layer 3: Linear(64, 32) + ReLU on the MXU.
    h = jnp.dot(w3_ref[...], h.astype(jnp.bfloat16),
                preferred_element_type=jnp.float32) + b3_ref[...]
    h = jnp.maximum(h, 0.0)           # [32, Bt] f32

    # Layer 4: Linear(32, 1).  N = 1, so do a VPU multiply + sublane (XLU)
    # reduction instead of a nearly-empty MXU pass.  b4 is a scalar in SMEM.
    o_ref[...] = (jnp.sum(w4_ref[...] * h, axis=0, keepdims=True)
                  + b4_ref[0])        # [1, Bt] f32


@functools.partial(jax.jit, static_argnames=("batch_tile",))
def response_model_forward(treatment, covariate, params, batch_tile=2048):
    """treatment: [B, 1], covariate: [B, 2]  ->  [B, 1] float32.

    `params` are PyTorch nn.Linear-layout tensors:
      (W1 [128,3], b1 [128], W2 [64,128], b2 [64],
       W3 [32,64], b3 [32], W4 [1,32], b4 [1]).
    """
    w1, b1, w2, b2, w3, b3, w4, b4 = params
    B = treatment.shape[0]

    # 128-aligned batch tile; pad the (padded) batch to a multiple of it.
    bt = _round_up(min(int(batch_tile), _round_up(B, 128)), 128)
    B_pad = _round_up(B, bt)
    grid = (B_pad // bt,)

    # Feature-major (lane-dense) inputs.  treatment.reshape is a free reshape;
    # only the tiny [B, 2] covariate is transposed.  No [B, 3] concat in HBM.
    tT = treatment.reshape(1, -1).astype(jnp.float32)      # [1, B]
    cT = covariate.astype(jnp.float32).T                   # [2, B]
    if B_pad != B:
        tT = jnp.pad(tT, ((0, 0), (0, B_pad - B)))
        cT = jnp.pad(cT, ((0, 0), (0, B_pad - B)))

    # Weight layouts for the transposed formulation h^T = W @ x^T.
    w1k = w1.astype(jnp.float32)                           # [128, 3]  (VPU)
    b1k = b1.reshape(-1, 1).astype(jnp.float32)            # [128, 1]
    w2k = w2.astype(jnp.bfloat16)                          # [64, 128] (MXU)
    b2k = b2.reshape(-1, 1).astype(jnp.float32)            # [64, 1]
    w3k = w3.astype(jnp.bfloat16)                          # [32, 64]  (MXU)
    b3k = b3.reshape(-1, 1).astype(jnp.float32)            # [32, 1]
    w4k = w4.reshape(1, -1).T.astype(jnp.float32)          # [32, 1]   (VPU/XLU)
    b4k = b4.reshape(-1).astype(jnp.float32)               # [1] scalar -> SMEM

    const = lambda i: (0, 0)
    batch = lambda i: (0, i)

    out = pl.pallas_call(
        _mlp_kernel,
        out_shape=jax.ShapeDtypeStruct((1, B_pad), jnp.float32),
        grid_spec=pltpu.PrefetchScalarGridSpec(
            num_scalar_prefetch=0,
            grid=grid,
            in_specs=[
                pl.BlockSpec((1, bt), batch),              # treatment^T tile
                pl.BlockSpec((2, bt), batch),              # covariate^T tile
                pl.BlockSpec(w1k.shape, const),            # W1 [128, 3]
                pl.BlockSpec(b1k.shape, const),            # b1 [128, 1]
                pl.BlockSpec(w2k.shape, const),            # W2 [64, 128]
                pl.BlockSpec(b2k.shape, const),            # b2 [64, 1]
                pl.BlockSpec(w3k.shape, const),            # W3 [32, 64]
                pl.BlockSpec(b3k.shape, const),            # b3 [32, 1]
                pl.BlockSpec(w4k.shape, const),            # W4^T [32, 1]
                pl.BlockSpec(memory_space=pltpu.MemorySpace.SMEM),  # b4 scalar
            ],
            out_specs=pl.BlockSpec((1, bt), batch),        # lane-dense output
        ),
        compiler_params=pltpu.CompilerParams(
            dimension_semantics=("parallel",)),  # batch axis shards across TCs on v7x
    )(tT, cT, w1k, b1k, w2k, b2k, w3k, b3k, w4k, b4k)

    return out[:, :B].reshape(B, 1)


def init_params(key):
    """PyTorch nn.Linear-style params: W [out, in], b [out]; U(+/- 1/sqrt(fan_in))."""
    dims = [(3, 128), (128, 64), (64, 32), (32, 1)]
    params = []
    for i, (fan_in, fan_out) in enumerate(dims):
        kw, kb = jax.random.split(jax.random.fold_in(key, i))
        bound = 1.0 / jnp.sqrt(float(fan_in))
        w = jax.random.uniform(kw, (fan_out, fan_in), jnp.float32,
                               minval=-bound, maxval=bound)
        b = jax.random.uniform(kb, (fan_out,), jnp.float32,
                               minval=-bound, maxval=bound)
        params += [w, b]
    return tuple(params)


def _reference_forward(treatment, covariate, params):
    """Pure-JAX reference with the same precision choices as the kernel
    (layers 1 & 4 in f32, layers 2 & 3 bf16 inputs / f32 accumulation)."""
    w1, b1, w2, b2, w3, b3, w4, b4 = params
    x = jnp.concatenate([treatment, covariate], axis=1).astype(jnp.float32)
    h = jnp.maximum(
        jnp.dot(x, w1.T, precision=jax.lax.Precision.HIGHEST) + b1, 0.0)
    h = jnp.maximum(
        jnp.dot(h.astype(jnp.bfloat16), w2.T.astype(jnp.bfloat16),
                preferred_element_type=jnp.float32) + b2, 0.0)
    h = jnp.maximum(
        jnp.dot(h.astype(jnp.bfloat16), w3.T.astype(jnp.bfloat16),
                preferred_element_type=jnp.float32) + b3, 0.0)
    return jnp.dot(h, w4.T, precision=jax.lax.Precision.HIGHEST) + b4


if __name__ == "__main__":
    key = jax.random.PRNGKey(0)
    k_t, k_c, k_p = jax.random.split(key, 3)
    params = init_params(k_p)

    # Small deterministic test (pads batch up to one 128-wide lane tile).
    B = 8
    treatment = jax.random.normal(k_t, (B, 1), jnp.float32)
    covariate = jax.random.normal(k_c, (B, 2), jnp.float32)
    out = jax.block_until_ready(
        response_model_forward(treatment, covariate, params))
    ref = _reference_forward(treatment, covariate, params)
    assert out.shape == (B, 1)
    assert jnp.allclose(out, ref, atol=2e-3, rtol=2e-3), "mismatch vs reference"

    # Exercise a multi-step grid (index maps / parallel batch axis).
    B2 = 384
    t2 = jax.random.normal(jax.random.fold_in(key, 1), (B2, 1), jnp.float32)
    c2 = jax.random.normal(jax.random.fold_in(key, 2), (B2, 2), jnp.float32)
    out2 = jax.block_until_ready(
        response_model_forward(t2, c2, params, batch_tile=128))
    ref2 = _reference_forward(t2, c2, params)
    assert out2.shape == (B2, 1)
    assert jnp.allclose(out2, ref2, atol=2e-3, rtol=2e-3), "mismatch (grid>1)"

    print("KERNEL_OK")
</pallas_src>

<mosaic_0001>
module attributes {stable_mosaic.version = 11 : i64} {
  func.func @_mlp_kernel(%arg0: i32, %arg1: memref<1x128xf32, #tpu.memory_space<vmem>>, %arg2: memref<2x128xf32, #tpu.memory_space<vmem>>, %arg3: memref<128x3xf32, #tpu.memory_space<vmem>>, %arg4: memref<128x1xf32, #tpu.memory_space<vmem>>, %arg5: memref<64x128xbf16, #tpu.memory_space<vmem>>, %arg6: memref<64x1xf32, #tpu.memory_space<vmem>>, %arg7: memref<32x64xbf16, #tpu.memory_space<vmem>>, %arg8: memref<32x1xf32, #tpu.memory_space<vmem>>, %arg9: memref<32x1xf32, #tpu.memory_space<vmem>>, %arg10: memref<1xf32, #tpu.memory_space<smem>>, %arg11: memref<1x128xf32, #tpu.memory_space<vmem>>) attributes {dimension_semantics = [#tpu.dimension_semantics<parallel>], iteration_bounds = array<i64: 1>, scalar_prefetch = 0 : i64, scratch_operands = 0 : i64, tpu.core_type = #tpu.core_type<tc>, window_params = [{transform_indices = @transform_0, window_bounds = array<i64: 1, 128>}, {transform_indices = @transform_1, window_bounds = array<i64: 2, 128>}, {pipeline_mode = #tpu.pipeline_mode<synchronous>, transform_indices = @transform_2, window_bounds = array<i64: 128, 3>}, {pipeline_mode = #tpu.pipeline_mode<synchronous>, transform_indices = @transform_3, window_bounds = array<i64: 128, 1>}, {pipeline_mode = #tpu.pipeline_mode<synchronous>, transform_indices = @transform_4, window_bounds = array<i64: 64, 128>}, {pipeline_mode = #tpu.pipeline_mode<synchronous>, transform_indices = @transform_5, window_bounds = array<i64: 64, 1>}, {pipeline_mode = #tpu.pipeline_mode<synchronous>, transform_indices = @transform_6, window_bounds = array<i64: 32, 64>}, {pipeline_mode = #tpu.pipeline_mode<synchronous>, transform_indices = @transform_7, window_bounds = array<i64: 32, 1>}, {pipeline_mode = #tpu.pipeline_mode<synchronous>, transform_indices = @transform_8, window_bounds = array<i64: 32, 1>}, {transform_indices = @transform_9, window_bounds = array<i64: 1>}, {transform_indices = @transform_10, window_bounds = array<i64: 1, 128>}]} {
    %c0 = arith.constant 0 : index
    %c0_0 = arith.constant 0 : index
    %0 = vector.load %arg1[%c0, %c0_0] : memref<1x128xf32, #tpu.memory_space<vmem>>, vector<1x128xf32>
    %c0_1 = arith.constant 0 : index
    %c0_2 = arith.constant 0 : index
    %1 = vector.load %arg2[%c0_1, %c0_2] : memref<2x128xf32, #tpu.memory_space<vmem>>, vector<2x128xf32>
    %c0_3 = arith.constant 0 : index
    %c0_4 = arith.constant 0 : index
    %2 = vector.load %arg3[%c0_3, %c0_4] : memref<128x3xf32, #tpu.memory_space<vmem>>, vector<128x3xf32>
    %3 = vector.extract_strided_slice %2 {offsets = [0, 0], sizes = [128, 1], strides = [1, 1]} : vector<128x3xf32> to vector<128x1xf32>
    %4 = vector.broadcast %3 : vector<128x1xf32> to vector<128x128xf32>
    %5 = vector.broadcast %0 : vector<1x128xf32> to vector<128x128xf32>
    %6 = arith.mulf %4, %5 : vector<128x128xf32>
    %7 = vector.extract_strided_slice %2 {offsets = [0, 1], sizes = [128, 1], strides = [1, 1]} : vector<128x3xf32> to vector<128x1xf32>
    %8 = vector.extract_strided_slice %1 {offsets = [0, 0], sizes = [1, 128], strides = [1, 1]} : vector<2x128xf32> to vector<1x128xf32>
    %9 = vector.broadcast %7 : vector<128x1xf32> to vector<128x128xf32>
    %10 = vector.broadcast %8 : vector<1x128xf32> to vector<128x128xf32>
    %11 = arith.mulf %9, %10 : vector<128x128xf32>
    %12 = arith.addf %6, %11 : vector<128x128xf32>
    %13 = vector.extract_strided_slice %2 {offsets = [0, 2], sizes = [128, 1], strides = [1, 1]} : vector<128x3xf32> to vector<128x1xf32>
    %14 = vector.extract_strided_slice %1 {offsets = [1, 0], sizes = [1, 128], strides = [1, 1]} : vector<2x128xf32> to vector<1x128xf32>
    %15 = vector.broadcast %13 : vector<128x1xf32> to vector<128x128xf32>
    %16 = vector.broadcast %14 : vector<1x128xf32> to vector<128x128xf32>
    %17 = arith.mulf %15, %16 : vector<128x128xf32>
    %18 = arith.addf %12, %17 : vector<128x128xf32>
    %c0_5 = arith.constant 0 : index
    %c0_6 = arith.constant 0 : index
    %19 = vector.load %arg4[%c0_5, %c0_6] : memref<128x1xf32, #tpu.memory_space<vmem>>, vector<128x1xf32>
    %20 = vector.broadcast %19 : vector<128x1xf32> to vector<128x128xf32>
    %21 = arith.addf %18, %20 : vector<128x128xf32>
    %cst = arith.constant 0.000000e+00 : f32
    %22 = vector.broadcast %cst : f32 to vector<128x128xf32>
    %23 = arith.maximumf %21, %22 : vector<128x128xf32>
    %c0_7 = arith.constant 0 : index
    %c0_8 = arith.constant 0 : index
    %24 = vector.load %arg5[%c0_7, %c0_8] : memref<64x128xbf16, #tpu.memory_space<vmem>>, vector<64x128xbf16>
    %25 = arith.truncf %23 : vector<128x128xf32> to vector<128x128xbf16>
    %cst_9 = arith.constant dense<0.000000e+00> : vector<64x128xf32>
    %26 = tpu.matmul %24, %25, %cst_9 {dimension_numbers = #tpu.dot_dimension_numbers<[1], [0], [0], [1], [0, 0, 1, 1], [], []>} : vector<64x128xbf16>, vector<128x128xbf16>, vector<64x128xf32> -> vector<64x128xf32>
    %c0_10 = arith.constant 0 : index
    %c0_11 = arith.constant 0 : index
    %27 = vector.load %arg6[%c0_10, %c0_11] : memref<64x1xf32, #tpu.memory_space<vmem>>, vector<64x1xf32>
    %28 = vector.broadcast %27 : vector<64x1xf32> to vector<64x128xf32>
    %29 = arith.addf %26, %28 : vector<64x128xf32>
    %cst_12 = arith.constant 0.000000e+00 : f32
    %30 = vector.broadcast %cst_12 : f32 to vector<64x128xf32>
    %31 = arith.maximumf %29, %30 : vector<64x128xf32>
    %c0_13 = arith.constant 0 : index
    %c0_14 = arith.constant 0 : index
    %32 = vector.load %arg7[%c0_13, %c0_14] : memref<32x64xbf16, #tpu.memory_space<vmem>>, vector<32x64xbf16>
    %33 = arith.truncf %31 : vector<64x128xf32> to vector<64x128xbf16>
    %cst_15 = arith.constant dense<0.000000e+00> : vector<32x128xf32>
    %34 = tpu.matmul %32, %33, %cst_15 {dimension_numbers = #tpu.dot_dimension_numbers<[1], [0], [0], [1], [0, 0, 1, 1], [], []>} : vector<32x64xbf16>, vector<64x128xbf16>, vector<32x128xf32> -> vector<32x128xf32>
    %c0_16 = arith.constant 0 : index
    %c0_17 = arith.constant 0 : index
    %35 = vector.load %arg8[%c0_16, %c0_17] : memref<32x1xf32, #tpu.memory_space<vmem>>, vector<32x1xf32>
    %36 = vector.broadcast %35 : vector<32x1xf32> to vector<32x128xf32>
    %37 = arith.addf %34, %36 : vector<32x128xf32>
    %cst_18 = arith.constant 0.000000e+00 : f32
    %38 = vector.broadcast %cst_18 : f32 to vector<32x128xf32>
    %39 = arith.maximumf %37, %38 : vector<32x128xf32>
    %c0_19 = arith.constant 0 : index
    %c0_20 = arith.constant 0 : index
    %40 = vector.load %arg9[%c0_19, %c0_20] : memref<32x1xf32, #tpu.memory_space<vmem>>, vector<32x1xf32>
    %41 = vector.broadcast %40 : vector<32x1xf32> to vector<32x128xf32>
    %42 = arith.mulf %41, %39 : vector<32x128xf32>
    %cst_21 = arith.constant dense<0.000000e+00> : vector<128xf32>
    %43 = vector.multi_reduction <add>, %42, %cst_21 [0] : vector<32x128xf32> to vector<128xf32>
    %44 = vector.shape_cast %43 : vector<128xf32> to vector<1x128xf32>
    %c0_22 = arith.constant 0 : index
    %45 = memref.load %arg10[%c0_22] : memref<1xf32, #tpu.memory_space<smem>>
    %46 = vector.broadcast %45 : f32 to vector<1x128xf32>
    %47 = arith.addf %44, %46 : vector<1x128xf32>
    %c0_23 = arith.constant 0 : index
    %c0_24 = arith.constant 0 : index
    %48 = vector.load %arg11[%c0_23, %c0_24] : memref<1x128xf32, #tpu.memory_space<vmem>>, vector<1x128xf32>
    tpu.vector_store %arg11[%c0_23, %c0_24], %47 {strides = array<i32>} : memref<1x128xf32, #tpu.memory_space<vmem>>, vector<1x128xf32>,
    return
  }
  func.func @transform_0(%arg0: i32) -> (i32, i32) {
    %c0_i32 = arith.constant 0 : i32
    %c0_i32_0 = arith.constant 0 : i32
    return %c0_i32, %arg0 : i32, i32
  }
  func.func @transform_1(%arg0: i32) -> (i32, i32) {
    %c0_i32 = arith.constant 0 : i32
    %c0_i32_0 = arith.constant 0 : i32
    return %c0_i32, %arg0 : i32, i32
  }
  func.func @transform_2(%arg0: i32) -> (i32, i32) {
    %c0_i32 = arith.constant 0 : i32
    %c0_i32_0 = arith.constant 0 : i32
    %c0_i32_1 = arith.constant 0 : i32
    return %c0_i32, %c0_i32_0 : i32, i32
  }
  func.func @transform_3(%arg0: i32) -> (i32, i32) {
    %c0_i32 = arith.constant 0 : i32
    %c0_i32_0 = arith.constant 0 : i32
    %c0_i32_1 = arith.constant 0 : i32
    return %c0_i32, %c0_i32_0 : i32, i32
  }
  func.func @transform_4(%arg0: i32) -> (i32, i32) {
    %c0_i32 = arith.constant 0 : i32
    %c0_i32_0 = arith.constant 0 : i32
    %c0_i32_1 = arith.constant 0 : i32
    return %c0_i32, %c0_i32_0 : i32, i32
  }
  func.func @transform_5(%arg0: i32) -> (i32, i32) {
    %c0_i32 = arith.constant 0 : i32
    %c0_i32_0 = arith.constant 0 : i32
    %c0_i32_1 = arith.constant 0 : i32
    return %c0_i32, %c0_i32_0 : i32, i32
  }
  func.func @transform_6(%arg0: i32) -> (i32, i32) {
    %c0_i32 = arith.constant 0 : i32
    %c0_i32_0 = arith.constant 0 : i32
    %c0_i32_1 = arith.constant 0 : i32
    return %c0_i32, %c0_i32_0 : i32, i32
  }
  func.func @transform_7(%arg0: i32) -> (i32, i32) {
    %c0_i32 = arith.constant 0 : i32
    %c0_i32_0 = arith.constant 0 : i32
    %c0_i32_1 = arith.constant 0 : i32
    return %c0_i32, %c0_i32_0 : i32, i32
  }
  func.func @transform_8(%arg0: i32) -> (i32, i32) {
    %c0_i32 = arith.constant 0 : i32
    %c0_i32_0 = arith.constant 0 : i32
    %c0_i32_1 = arith.constant 0 : i32
    return %c0_i32, %c0_i32_0 : i32, i32
  }
  func.func @transform_9(%arg0: i32) -> i32 {
    %c0_i32 = arith.constant 0 : i32
    %c0_i32_0 = arith.constant 0 : i32
    return %c0_i32 : i32
  }
  func.func @transform_10(%arg0: i32) -> (i32, i32) {
    %c0_i32 = arith.constant 0 : i32
    %c0_i32_0 = arith.constant 0 : i32
    return %c0_i32, %arg0 : i32, i32
  }
}

</mosaic_0001>

<bundles_post_ra>
// kernel: response_model_forward.1
= control target key start
LH: loop header
LB: loop body
LE: loop exit
PB: predicated region body
PF: predicated region fallthrough
CT: control target
= control target key end

     0   :  { %v814_v0 = vmov 2   ;;  %v815_v1 = vmov 0   ;;  %v816_v14 = vmov 1   ;;  %vm643_vm0 = vcmask 523264   ;;  %s1275_s2 = inlined_call_operand.vmem [shape: f32[128,3], index: 2, kind: input, shape index: {}]   ;;  %s1276_s0 = inlined_call_operand.vmem [shape: f32[1,128], index: 0, kind: input, shape index: {}]   ;;  %s1277_s3 = inlined_call_operand.vmem [shape: f32[128,1], index: 3, kind: input, shape index: {}]   ;;  %s1278_s1 = inlined_call_operand.vmem [shape: f32[2,128], index: 1, kind: input, shape index: {}]   ;;  %s1279_s5 = inlined_call_operand.vmem [shape: f32[64,1], index: 5, kind: input, shape index: {}]   ;;  %s1280_s7 = inlined_call_operand.vmem [shape: f32[32,1], index: 7, kind: input, shape index: {}]   ;;  %s1281_s8 = inlined_call_operand.vmem [shape: f32[32,1], index: 8, kind: input, shape index: {}]   ;;  %s1282_s4 = inlined_call_operand.vmem [shape: bf16[64,128], index: 4, kind: input, shape index: {}]   ;;  %s1283_s6 = inlined_call_operand.vmem [shape: bf16[32,64], index: 6, kind: input, shape index: {}]   ;;  %s1284_s9 = inlined_call_operand.<no memory space> [shape: f32[1], index: 9, kind: input, shape index: {}]   ;;  %s1285_s10 = inlined_call_operand.vmem [shape: f32[1,128], index: 10, kind: output, shape index: {}]  }
   0x1   :  { %778 = vset.pattern.permute.xlu0 %v814_v0  ;;  %770 = vset.pattern.permute.xlu2 %v815_v1  ;;  %v52_v2 = vld [vmem:[%s1275_s2 + $0x68] sm:$0xff]  ;;  %v880_v3 = vld [vmem:[%s1275_s2 + $0x20] sm:$0xff]  ;;  %v885_v4 = vld [vmem:[%s1275_s2 + $0x10] sm:$0xff] }
   0x2   :  { %769 = vset.pattern.permute.xlu1 %v815_v1  ;;  %304 = vperm.xlu0 %778, %v52_v2   ;;  %v893_v5 = vld [vmem:[%s1275_s2 + $0x48] sm:$0xff]  ;;  %v903_v7 = vld [vmem:[%s1275_s2 + $0x18] sm:$0xff]  ;;  %v911_v8 = vld [vmem:[%s1275_s2 + $0x30] sm:$0xff] }
   0x3   :  { %77 = vperm.xlu2 %770, %v880_v3   ;;  %67 = vperm.xlu1 %769, %v885_v4   ;;  %v898_v6 = vld [vmem:[%s1275_s2 + $0x28] sm:$0xff]  ;;  %v916_v9 = vld [vmem:[%s1275_s2 + $0x40] sm:$0xff]  ;;  %v921_v10 = vld [vmem:[%s1275_s2 + $0x38] sm:$0xff] }
   0x4   :  { %v54_v11 = vld [vmem:[%s1275_s2 + $0x78] sm:$0xff]  ;;  %v53_v12 = vld [vmem:[%s1275_s2 + $0x70] sm:$0xff]  ;;  %v935_v13 = vld [vmem:[%s1275_s2] sm:$0xff] }
   0x5   :  { %v943_v15 = vld [vmem:[%s1275_s2 + $0x8] sm:$0xff]  ;;  %v51_v16 = vld [vmem:[%s1275_s2 + $0x60] sm:$0xff]  ;;  %v362_v18 = vld [vmem:[%s1277_s3 + $0x70] sm:$0xff] }
   0x6   :  { %v361_v17 = vld [vmem:[%s1277_s3 + $0x68] sm:$0xff]  ;;  %v363_v19 = vld [vmem:[%s1277_s3 + $0x78] sm:$0xff]  ;;  %v49_v21 = vld [vmem:[%s1275_s2 + $0x50] sm:$0xff] }
   0x7   :  { %v357_v20 = vld [vmem:[%s1277_s3 + $0x48] sm:$0xff]  ;;  %v50_v22 = vld [vmem:[%s1275_s2 + $0x58] sm:$0xff]  ;;  %v354_v23 = vld [vmem:[%s1277_s3 + $0x30] sm:$0xff] }
   0x8   :  { %v360_v24 = vld [vmem:[%s1277_s3 + $0x60] sm:$0xff]  ;;  %v358_v28 = vld [vmem:[%s1277_s3 + $0x50] sm:$0xff]  ;;  %v359_v29 = vld [vmem:[%s1277_s3 + $0x58] sm:$0xff] }
   0x9   :  { %v356_v37 = vld [vmem:[%s1277_s3 + $0x40] sm:$0xff]  ;;  %v355_v47 = vld [vmem:[%s1277_s3 + $0x38] sm:$0xff]  ;;  %v353_v55 = vld [vmem:[%s1277_s3 + $0x28] sm:$0xff] }
   0xa   :  { %288 = vperm.xlu0 %778, %v893_v5   ;;  %v352_v54 = vld [vmem:[%s1277_s3 + $0x20] sm:$0xff] }
   0xb   :  { %82 = vperm.xlu2 %770, %v898_v6   ;;  %72 = vperm.xlu1 %769, %v903_v7   ;;  %v38_v61 = vld [vmem:[%s1278_s1] sm:$0x3] }
   0xc   :  { %v1106_v63 = vld [vmem:[%s1276_s0] ss:$0 sm:$0xff] }
  0x12   :  { %276 = vperm.xlu0 %778, %v911_v8  }
  0x13   :  { %97 = vperm.xlu2 %770, %v916_v9   ;;  %92 = vperm.xlu1 %769, %v921_v10  }
  0x1a   :  { %793 = vset.pattern.permute.xlu0 %v815_v1 }
  0x1b   :  { %771 = vset.pattern.permute.xlu2 %v816_v14  ;;  %132 = vperm.xlu1 %769, %v54_v11  }
  0x1c   :  { %211 = vperm.xlu2 %771, %v53_v12   ;;  %57 = vperm.xlu0 %793, %v935_v13  }
  0x23   :  { %772 = vset.pattern.permute.xlu1 %v814_v0 }
  0x24   :  { %773 = vset.pattern.permute.xlu2 %v814_v0  ;;  %308 = vperm.xlu1 %772, %v53_v12  }
  0x25   :  { %62 = vperm.xlu0 %793, %v943_v15   ;;  %312 = vperm.xlu2 %773, %v54_v11  }
  0x2c   :  { %774 = vset.pattern.permute.xlu1 %v815_v1 }
  0x2d   :  { %87 = vperm.xlu0 %793, %v911_v8   ;;  %775 = vset.pattern.permute.xlu2 %v815_v1 }
  0x2e   :  { %117 = vperm.xlu1 %774, %v51_v16   ;;  %122 = vperm.xlu2 %775, %v52_v2  }
  0x35   :  { %127 = vperm.xlu0 %793, %v53_v12  }
  0x36   :  { %776 = vset.pattern.permute.xlu1 %v816_v14  ;;  %777 = vset.pattern.permute.xlu2 %v814_v0 }
  0x37   :  { %207 = vperm.xlu1 %776, %v52_v2   ;;  %300 = vperm.xlu2 %777, %v51_v16   ;;  %v1108_v2 = vperm.slane %v38_v61, 0 }
  0x3d   :  { %431 = vperm.xlu0 %793, %v361_v17  }
  0x3f   :  { %779 = vset.pattern.permute.xlu1 %v815_v1  ;;  %780 = vset.pattern.permute.xlu2 %v815_v1 }
  0x40   :  { %436 = vperm.xlu1 %779, %v362_v18   ;;  %441 = vperm.xlu2 %780, %v363_v19   ;;  %v348_v18 = vld [vmem:[%s1277_s3] sm:$0xff]  ;;  %v349_v19 = vld [vmem:[%s1277_s3 + $0x8] sm:$0xff] }
  0x45   :  { %411 = vperm.xlu0 %793, %v357_v20  }
  0x48   :  { %107 = vperm.xlu1 %779, %v49_v21   ;;  %112 = vperm.xlu2 %780, %v50_v22  }
  0x4d   :  { %396 = vperm.xlu0 %793, %v354_v23  }
  0x50   :  { %781 = vset.pattern.permute.xlu1 %v816_v14  ;;  %782 = vset.pattern.permute.xlu2 %v814_v0 }
  0x51   :  { %199 = vperm.xlu1 %781, %v50_v22   ;;  %292 = vperm.xlu2 %782, %v49_v21  }
  0x55   :  { %800 = vset.pattern.permute.xlu0 %v816_v14 }
  0x56   :  { %215 = vperm.xlu0 %800, %v54_v11  }
  0x59   :  { %783 = vset.pattern.permute.xlu1 %v814_v0  ;;  %784 = vset.pattern.permute.xlu2 %v815_v1 }
  0x5a   :  { %296 = vperm.xlu1 %783, %v50_v22   ;;  %426 = vperm.xlu2 %784, %v360_v24  }
  0x5d   :  { %v987_v25 = vpop.permute.xlu2 %77 }
  0x5e   :  { %203 = vperm.xlu0 %800, %v51_v16  }
  0x62   :  { %785 = vset.pattern.permute.xlu1 %v815_v1  ;;  %786 = vset.pattern.permute.xlu2 %v816_v14 }
  0x63   :  { %102 = vperm.xlu1 %785, %v893_v5   ;;  %187 = vperm.xlu2 %786, %v916_v9  }
  0x65   :  { %v993_v26 = vpop.permute.xlu2 %82 }
  0x66   :  { %195 = vperm.xlu0 %800, %v49_v21  }
  0x6b   :  { %787 = vset.pattern.permute.xlu1 %v816_v14  ;;  %788 = vset.pattern.permute.xlu2 %v814_v0 }
  0x6c   :  { %191 = vperm.xlu1 %787, %v893_v5   ;;  %284 = vperm.xlu2 %788, %v916_v9   ;;  %v351_v5 = vld [vmem:[%s1277_s3 + $0x18] sm:$0xff] }
  0x6d   :  { %v999_v27 = vpop.permute.xlu2 %97 }
  0x6e   :  { %167 = vperm.xlu0 %800, %v903_v7  }
  0x74   :  { %789 = vset.pattern.permute.xlu1 %v815_v1  ;;  %790 = vset.pattern.permute.xlu2 %v815_v1  ;;  %v1010_v30 = vpop.permute.xlu0 %304 }
  0x75   :  { %416 = vperm.xlu1 %789, %v358_v28   ;;  %421 = vperm.xlu2 %790, %v359_v29   ;;  %v1012_v31 = vpop.permute.xlu1 %67 }
  0x76   :  { %155 = vperm.xlu0 %800, %v935_v13   ;;  %v1015_v32 = vpop.permute.xlu2 %211 }
  0x7c   :  { %v1017_v33 = vpop.permute.xlu0 %288 }
  0x7d   :  { %791 = vset.pattern.permute.xlu1 %v816_v14  ;;  %792 = vset.pattern.permute.xlu2 %v816_v14  ;;  %v1021_v34 = vpop.permute.xlu1 %72 }
  0x7e   :  { %179 = vperm.xlu1 %791, %v911_v8   ;;  %183 = vperm.xlu2 %792, %v921_v10  }
  0x7f   :  { %v1025_v35 = vpop.permute.xlu2 %312  ;;  %809 = vset.pattern.permute.xlu0 %v814_v0 }
  0x80   :  { %256 = vperm.xlu0 %809, %v943_v15  }
  0x84   :  { %v1029_v36 = vpop.permute.xlu0 %276 }
  0x85   :  { %v1034_v38 = vpop.permute.xlu1 %92 }
  0x86   :  { %794 = vset.pattern.permute.xlu1 %v814_v0  ;;  %795 = vset.pattern.permute.xlu2 %v815_v1 }
  0x87   :  { %280 = vperm.xlu1 %794, %v921_v10   ;;  %406 = vperm.xlu2 %795, %v356_v37  }
  0x88   :  { %v1039_v39 = vpop.permute.xlu2 %122  ;;  %812 = vset.pattern.permute.xlu0 %v815_v1 }
  0x8d   :  { %v1042_v40 = vpop.permute.xlu1 %132 }
  0x8e   :  { %v1044_v41 = vpop.permute.xlu0 %57  ;;  %v153_v11 = vmul.f32 %v1106_v63, %v1042_v40 }
  0x8f   :  { %796 = vset.pattern.permute.xlu1 %v816_v14  ;;  %797 = vset.pattern.permute.xlu2 %v816_v14 }
  0x90   :  { %171 = vperm.xlu1 %796, %v880_v3   ;;  %175 = vperm.xlu2 %797, %v898_v6  }
  0x91   :  { %v1050_v42 = vpop.permute.xlu2 %300 }
  0x96   :  { %v309_v43 = vpop.permute.xlu1 %308 }
  0x97   :  { %v1052_v44 = vpop.permute.xlu0 %62 }
  0x98   :  { %798 = vset.pattern.permute.xlu1 %v814_v0  ;;  %799 = vset.pattern.permute.xlu2 %v814_v0 }
  0x99   :  { %268 = vperm.xlu1 %798, %v880_v3   ;;  %272 = vperm.xlu2 %799, %v898_v6   ;;  %v1117_v6 = vperm.slane %v38_v61, 1 }
  0x9a   :  { %v1058_v45 = vpop.permute.xlu2 %441 }
  0x9b   :  { %v330_v12 = vmul.f32 %v1117_v6, %v309_v43  ;;  %v329_v21 = vmul.f32 %v1117_v6, %v1010_v30  ;;  %v328_v30 = vmul.f32 %v1117_v6, %v1050_v42 }
  0x9f   :  { %v1060_v46 = vpop.permute.xlu0 %87 }
  0xa0   :  { %v1065_v48 = vpop.permute.xlu1 %117 }
  0xa1   :  { %801 = vset.pattern.permute.xlu1 %v815_v1  ;;  %802 = vset.pattern.permute.xlu2 %v816_v14 }
  0xa2   :  { %401 = vperm.xlu1 %801, %v355_v47   ;;  %163 = vperm.xlu2 %802, %v885_v4   ;;  %v1070_v49 = vpop.permute.xlu2 %112 }
  0xa7   :  { %v128_v50 = vpop.permute.xlu0 %127 }
  0xa9   :  { %v208_v51 = vpop.permute.xlu1 %207 }
  0xaa   :  { %803 = vset.pattern.permute.xlu1 %v814_v0  ;;  %804 = vset.pattern.permute.xlu2 %v814_v0 }
  0xab   :  { %260 = vperm.xlu1 %803, %v885_v4   ;;  %264 = vperm.xlu2 %804, %v903_v7   ;;  %v1076_v52 = vpop.permute.xlu2 %292  ;;  %v350_v4 = vld [vmem:[%s1277_s3 + $0x10] sm:$0xff]  ;;  %v233_v7 = vmul.f32 %v1108_v2, %v1015_v32  ;;  %v150_v32 = vmul.f32 %v1106_v63, %v1065_v48 }
  0xaf   :  { %v1078_v53 = vpop.permute.xlu0 %431 }
  0xb2   :  { %v437_v56 = vpop.permute.xlu1 %436 }
  0xb3   :  { %805 = vset.pattern.permute.xlu1 %v815_v1  ;;  %806 = vset.pattern.permute.xlu2 %v815_v1 }
  0xb4   :  { %386 = vperm.xlu1 %805, %v352_v54   ;;  %391 = vperm.xlu2 %806, %v353_v55   ;;  %v1088_v57 = vpop.permute.xlu2 %426 }
  0xb7   :  { %v1090_v58 = vpop.permute.xlu0 %411 }
  0xba   :  { %v1092_v59 = vpop.permute.xlu1 %107 }
  0xbc   :  { %807 = vset.pattern.permute.xlu1 %v816_v14  ;;  %808 = vset.pattern.permute.xlu2 %v814_v0  ;;  %v152_v0 = vmul.f32 %v1106_v63, %v128_v50 }
  0xbd   :  { %159 = vperm.xlu1 %807, %v943_v15   ;;  %v188_v60 = vpop.permute.xlu2 %187  ;;  %252 = vperm.xlu2 %808, %v935_v13   ;;  %v232_v13 = vmul.f32 %v1108_v2, %v208_v51  ;;  %v331_v15 = vmul.f32 %v1117_v6, %v1025_v35  ;;  %v499_v51 = vld [vmem:[%s1279_s5 + $0x38] sm:$0xff] }
  0xbe   :  { %v249_v9 = vadd.f32 %v233_v7, %v152_v0 }
  0xbf   :  { %v1101_v62 = vpop.permute.xlu0 %396 }
  0xc0   :  { %v346_v16 = vadd.f32 %v330_v12, %v249_v9 }
  0xc2   :  { %v458_v23 = vadd.f32 %v437_v56, %v346_v16 }
  0xc3   :  { %v200_v3 = vpop.permute.xlu1 %199 }
  0xc4   :  { %v230_v9 = vmul.f32 %v1108_v2, %v200_v3 }
  0xc5   :  { %810 = vset.pattern.permute.xlu1 %v815_v1  ;;  %811 = vset.pattern.permute.xlu2 %v815_v1  ;;  %v151_v1 = vmul.f32 %v1106_v63, %v1039_v39  ;;  %v474_v39 = vmax.f32 %v458_v23, 0.0  ;;  %v492_v23 = vld [vmem:[%s1279_s5] sm:$0xff] }
  0xc6   :  { %376 = vperm.xlu1 %810, %v350_v4   ;;  %v285_v8 = vpop.permute.xlu2 %284  ;;  %381 = vperm.xlu2 %811, %v351_v5   ;;  %v227_v4 = vmul.f32 %v1108_v2, %v188_v60  ;;  %v149_v60 = vmul.f32 %v1106_v63, %v1070_v49  ;;  %v325_v49 = vmul.f32 %v1117_v6, %v1017_v33 }
  0xc7   :  { %v248_v22 = vadd.f32 %v232_v13, %v151_v1 }
  0xc8   :  { %v216_v10 = vpop.permute.xlu0 %215 }
  0xc9   :  { %v234_v14 = vmul.f32 %v1108_v2, %v216_v10  ;;  %v345_v37 = vadd.f32 %v329_v21, %v248_v22  ;;  %v494_v10 = vld [vmem:[%s1279_s5 + $0x10] sm:$0xff] }
  0xcb   :  { %v250_v17 = vadd.f32 %v234_v14, %v153_v11  ;;  %v457_v48 = vadd.f32 %v1078_v53, %v345_v37  ;;  %v497_v53 = vld [vmem:[%s1279_s5 + $0x28] sm:$0xff]  ;;  %v324_v11 = vmul.f32 %v1117_v6, %v285_v8  ;;  %v246_v8 = vadd.f32 %v230_v9, %v149_v60 }
  0xcc   :  { %v297_v20 = vpop.permute.xlu1 %296 }
  0xcd   :  { %v347_v24 = vadd.f32 %v331_v15, %v250_v17  ;;  %v473_v61 = vmax.f32 %v457_v48, 0.0  ;;  %v327_v12 = vmul.f32 %v1117_v6, %v297_v20  ;;  %v322_v48 = vmul.f32 %v1117_v6, %v1029_v36  ;;  %v676_v36 = vld [vmem:[%s1281_s8 + $0x18] sm:$0xff] }
  0xce   :  { %366 = vperm.xlu1 %810, %v348_v18   ;;  %371 = vperm.xlu2 %811, %v349_v19  }
  0xcf   :  { %v422_v28 = vpop.permute.xlu2 %421  ;;  %v459_v29 = vadd.f32 %v1058_v45, %v347_v24  ;;  %v496_v45 = vld [vmem:[%s1279_s5 + $0x20] sm:$0xff]  ;;  %v343_v19 = vadd.f32 %v327_v12, %v246_v8  ;;  %v326_v24 = vmul.f32 %v1117_v6, %v1076_v52  ;;  %v610_v52 = vld [vmem:[%s1280_s7 + $0x8] sm:$0xff] }
  0xd0   :  { %v204_v35 = vpop.permute.xlu0 %203 }
  0xd1   :  { %v231_v40 = vmul.f32 %v1108_v2, %v204_v35  ;;  %v475_v43 = vmax.f32 %v459_v29, 0.0  ;;  %v455_v29 = vadd.f32 %v422_v28, %v343_v19 }
  0xd3   :  { %v247_v47 = vadd.f32 %v231_v40, %v150_v32  ;;  %v491_v50 = vpack.c.bf16 %v475_v43, %v474_v39 }
  0xd5   :  { %v344_v54 = vadd.f32 %v328_v30, %v247_v47  ;;  %v103_v55 = vpop.permute.xlu1 %102  ;;  %564 = vmatpush.bf16.msra.mxu0 %v491_v50  ;;  %750 = vmatpush.bf16.msra.mxu2 %v491_v50  ;;  %v471_v30 = vmax.f32 %v455_v29, 0.0 }
  0xd6   :  { %751 = vmatpush.bf16.msra.mxu3 %v491_v50  ;;  %537 = vperm.xlu1 %810, %v499_v51   ;;  %v147_v15 = vmul.f32 %v1106_v63, %v103_v55  ;;  %v144_v51 = vmul.f32 %v1106_v63, %v1060_v46  ;;  %v673_v55 = vld [vmem:[%s1281_s8] sm:$0xff] }
  0xd7   :  { %522 = vperm.xlu2 %811, %v496_v45   ;;  %v456_v42 = vadd.f32 %v1088_v57, %v344_v54  ;;  %v146_v57 = vmul.f32 %v1106_v63, %v999_v27  ;;  %v148_v27 = vmul.f32 %v1106_v63, %v1092_v59  ;;  %v493_v59 = vld [vmem:[%s1279_s5 + $0x8] sm:$0xff] }
  0xd8   :  { %v1154_v56 = vpop.permute.xlu2 %183  ;;  %v196_v5 = vpop.permute.xlu0 %195 }
  0xd9   :  { %v472_v0 = vmax.f32 %v456_v42, 0.0  ;;  %v229_v13 = vmul.f32 %v1108_v2, %v196_v5  ;;  %v243_v14 = vadd.f32 %v227_v4, %v146_v57  ;;  %v145_v57 = vmul.f32 %v1106_v63, %v1034_v38 }
  0xdb   :  { %v490_v7 = vpack.c.bf16 %v473_v61, %v472_v0  ;;  %v340_v18 = vadd.f32 %v324_v11, %v243_v14  ;;  %v245_v20 = vadd.f32 %v229_v13, %v148_v27  ;;  %v674_v61 = vld [vmem:[%s1281_s8 + $0x8] sm:$0xff] }
  0xdd   :  { %565 = vmatpush.bf16.msra.mxu0 %v490_v7  ;;  %752 = vmatpush.bf16.msra.mxu2 %v490_v7  ;;  %v342_v32 = vadd.f32 %v326_v24, %v245_v20 }
  0xde   :  { %753 = vmatpush.bf16.msra.mxu3 %v490_v7  ;;  %v192_v3 = vpop.permute.xlu1 %191  ;;  %527 = vperm.xlu1 %810, %v497_v53  }
  0xdf   :  { %v228_v1 = vmul.f32 %v1108_v2, %v192_v3  ;;  %512 = vperm.xlu2 %811, %v494_v10   ;;  %v226_v10 = vmul.f32 %v1108_v2, %v1154_v56  ;;  %v143_v56 = vmul.f32 %v1106_v63, %v993_v26 }
  0xe0   :  { %v168_v20 = vpop.permute.xlu0 %167 }
  0xe1   :  { %v244_v16 = vadd.f32 %v228_v1, %v147_v15  ;;  %v407_v17 = vpop.permute.xlu2 %406  ;;  %v242_v11 = vadd.f32 %v226_v10, %v145_v57 }
  0xe2   :  { %v452_v22 = vadd.f32 %v407_v17, %v340_v18  ;;  %v142_v17 = vmul.f32 %v1106_v63, %v987_v25  ;;  %v222_v25 = vmul.f32 %v1108_v2, %v168_v20 }
  0xe3   :  { %v341_v21 = vadd.f32 %v325_v49, %v244_v16 }
  0xe4   :  { %v468_v35 = vmax.f32 %v452_v22, 0.0 }
  0xe5   :  { %v453_v33 = vadd.f32 %v1090_v58, %v341_v21  ;;  %v611_v58 = vld [vmem:[%s1280_s7 + $0x10] sm:$0xff] }
  0xe6   :  { %502 = vperm.xlu1 %810, %v492_v23  }
  0xe7   :  { %v469_v37 = vmax.f32 %v453_v33, 0.0  ;;  %v417_v39 = vpop.permute.xlu1 %416  ;;  %507 = vperm.xlu2 %811, %v493_v59  }
  0xe8   :  { %v454_v40 = vadd.f32 %v417_v39, %v342_v32 }
  0xe9   :  { %v488_v43 = vpack.c.bf16 %v469_v37, %v468_v35  ;;  %v156_v37 = vpop.permute.xlu0 %155 }
  0xea   :  { %v470_v47 = vmax.f32 %v454_v40, 0.0  ;;  %v176_v0 = vpop.permute.xlu2 %175  ;;  %v141_v40 = vmul.f32 %v1106_v63, %v1021_v34  ;;  %v139_v34 = vmul.f32 %v1106_v63, %v1052_v44  ;;  %v495_v44 = vld [vmem:[%s1279_s5 + $0x18] sm:$0xff] }
  0xeb   :  { %v224_v27 = vmul.f32 %v1108_v2, %v176_v0 }
  0xec   :  { %v489_v50 = vpack.c.bf16 %v471_v30, %v470_v47  ;;  %v498_v47 = vld [vmem:[%s1279_s5 + $0x30] sm:$0xff] }
  0xed   :  { %v240_v18 = vadd.f32 %v224_v27, %v143_v56  ;;  %532 = vperm.xlu0 %812, %v498_v47   ;;  %v675_v27 = vld [vmem:[%s1281_s8 + $0x10] sm:$0xff] }
  0xee   :  { %620 = vperm.xlu1 %810, %v610_v52   ;;  %566 = vmatpush.bf16.msra.mxu0 %v489_v50  ;;  %v140_v52 = vmul.f32 %v1106_v63, %v1012_v31  ;;  %v219_v31 = vmul.f32 %v1108_v2, %v156_v37 }
  0xef   :  { %754 = vmatpush.bf16.msra.mxu2 %v489_v50  ;;  %755 = vmatpush.bf16.msra.mxu3 %v489_v50  ;;  %v238_v50 = vadd.f32 %v222_v25, %v141_v40 }
  0xf0   :  { %625 = vperm.xlu2 %811, %v611_v58   ;;  %v180_v28 = vpop.permute.xlu1 %179 }
  0xf1   :  { %v225_v45 = vmul.f32 %v1108_v2, %v180_v28 }
  0xf2   :  { %567 = vmatpush.bf16.msra.mxu0 %v488_v43 }
  0xf3   :  { %v241_v54 = vadd.f32 %v225_v45, %v144_v51  ;;  %756 = vmatpush.bf16.msra.mxu2 %v488_v43  ;;  %757 = vmatpush.bf16.msra.mxu3 %v488_v43  ;;  %v273_v5 = vpop.permute.xlu2 %272  ;;  %v257_v45 = vpop.permute.xlu0 %256 }
  0xf4   :  { %v321_v38 = vmul.f32 %v1117_v6, %v273_v5 }
  0xf5   :  { %v338_v42 = vadd.f32 %v322_v48, %v241_v54  ;;  %517 = vperm.xlu0 %812, %v495_v44  }
  0xf6   :  { %679 = vperm.xlu1 %810, %v673_v55   ;;  %v337_v22 = vadd.f32 %v321_v38, %v240_v18 }
  0xf7   :  { %v450_v46 = vadd.f32 %v1101_v62, %v338_v42 }
  0xf8   :  { %684 = vperm.xlu2 %811, %v674_v61   ;;  %v317_v61 = vmul.f32 %v1117_v6, %v257_v45 }
  0xf9   :  { %v281_v4 = vpop.permute.xlu1 %280  ;;  %v466_v14 = vmax.f32 %v450_v46, 0.0 }
  0xfa   :  { %v323_v62 = vmul.f32 %v1117_v6, %v281_v4 }
  0xfc   :  { %v164_v9 = vpop.permute.xlu2 %163  ;;  %v339_v60 = vadd.f32 %v323_v62, %v242_v11 }
  0xfd   :  { %v221_v43 = vmul.f32 %v1108_v2, %v164_v9 }
  0xfe   :  { %694 = vperm.xlu1 %810, %v676_v36   ;;  %v138_v36 = vmul.f32 %v1106_v63, %v1044_v41  ;;  %v609_v63 = vld [vmem:[%s1280_s7] sm:$0xff] }
  0xff   :  { %v237_v48 = vadd.f32 %v221_v43, %v140_v52  ;;  %615 = vperm.xlu0 %812, %v609_v63  }
 0x100   :  { %v235_v10 = vadd.f32 %v219_v31, %v138_v36 }
 0x102   :  { %v172_v7 = vpop.permute.xlu1 %171 }
 0x103   :  { %v223_v49 = vmul.f32 %v1108_v2, %v172_v7 }
 0x105   :  { %v265_v3 = vpop.permute.xlu2 %264  ;;  %v239_v21 = vadd.f32 %v223_v49, %v142_v17 }
 0x106   :  { %v319_v30 = vmul.f32 %v1117_v6, %v265_v3  ;;  %v744_v3 = vld [vmem:[%s1282_s4] sm:$0xff] }
 0x108   :  { %v335_v54 = vadd.f32 %v319_v30, %v238_v50 }
 0x10b   :  { %v269_v53 = vpop.permute.xlu1 %268 }
 0x10c   :  { %v320_v19 = vmul.f32 %v1117_v6, %v269_v53 }
 0x10e   :  { %v392_v16 = vpop.permute.xlu2 %391  ;;  %v336_v24 = vadd.f32 %v320_v19, %v239_v21 }
 0x10f   :  { %v449_v23 = vadd.f32 %v392_v16, %v337_v22 }
 0x111   :  { %v465_v29 = vmax.f32 %v449_v23, 0.0 }
 0x114   :  { %v402_v12 = vpop.permute.xlu1 %401 }
 0x115   :  { %v451_v13 = vadd.f32 %v402_v12, %v339_v60 }
 0x117   :  { %v467_v15 = vmax.f32 %v451_v13, 0.0  ;;  %v253_v32 = vpop.permute.xlu2 %252 }
 0x118   :  { %v316_v5 = vmul.f32 %v1117_v6, %v253_v32 }
 0x119   :  { %v487_v1 = vpack.c.bf16 %v467_v15, %v466_v14  ;;  %v745_v14 = vld [vmem:[%s1282_s4 + $0x8] sm:$0xff]  ;;  %v746_v15 = vld [vmem:[%s1282_s4 + $0x10] sm:$0xff] }
 0x11b   :  { %568 = vmatpush.bf16.msra.mxu0 %v487_v1  ;;  %758 = vmatpush.bf16.msra.mxu2 %v487_v1 }
 0x11c   :  { %759 = vmatpush.bf16.msra.mxu3 %v487_v1  ;;  %v612_v1 = vld [vmem:[%s1280_s7 + $0x18] sm:$0xff] }
 0x11d   :  { %v261_v8 = vpop.permute.xlu1 %260  ;;  %630 = vperm.xlu0 %812, %v612_v1  }
 0x11e   :  { %v318_v58 = vmul.f32 %v1117_v6, %v261_v8  ;;  %v747_v8 = vld [vmem:[%s1282_s4 + $0x18] sm:$0xff] }
 0x120   :  { %v382_v51 = vpop.permute.xlu2 %381  ;;  %v334_v46 = vadd.f32 %v318_v58, %v237_v48 }
 0x121   :  { %v447_v55 = vadd.f32 %v382_v51, %v335_v54 }
 0x123   :  { %v463_v7 = vmax.f32 %v447_v55, 0.0 }
 0x125   :  { %689 = vperm.xlu0 %812, %v675_v27  }
 0x126   :  { %v387_v59 = vpop.permute.xlu1 %386 }
 0x127   :  { %v448_v33 = vadd.f32 %v387_v59, %v336_v24 }
 0x128   :  { %v372_v62 = vpop.permute.xlu2 %371 }
 0x129   :  { %v464_v26 = vmax.f32 %v448_v33, 0.0 }
 0x12b   :  { %v486_v35 = vpack.c.bf16 %v465_v29, %v464_v26 }
 0x12d   :  { %569 = vmatpush.bf16.msra.mxu0 %v486_v35  ;;  %760 = vmatpush.bf16.msra.mxu2 %v486_v35 }
 0x12e   :  { %761 = vmatpush.bf16.msra.mxu3 %v486_v35 }
 0x12f   :  { %v160_v39 = vpop.permute.xlu1 %159 }
 0x130   :  { %v220_v28 = vmul.f32 %v1108_v2, %v160_v39  ;;  %v332_v2 = vadd.f32 %v316_v5, %v235_v10 }
 0x131   :  { %v523_v49 = vpop.permute.xlu2 %522 }
 0x132   :  { %v236_v42 = vadd.f32 %v220_v28, %v139_v34 }
 0x134   :  { %v333_v53 = vadd.f32 %v317_v61, %v236_v42  ;;  %v748_v61 = vld [vmem:[%s1283_s6] sm:$0xff] }
 0x136   :  { %v445_v11 = vadd.f32 %v372_v62, %v333_v53 }
 0x138   :  { %v377_v0 = vpop.permute.xlu1 %376  ;;  %v461_v12 = vmax.f32 %v445_v11, 0.0 }
 0x139   :  { %v446_v4 = vadd.f32 %v377_v0, %v334_v46  ;;  %v513_v21 = vpop.permute.xlu2 %512  ;;  %v749_v46 = vld [vmem:[%s1283_s6 + $0x8] sm:$0xff] }
 0x13b   :  { %v462_v9 = vmax.f32 %v446_v4, 0.0 }
 0x13d   :  { %v485_v57 = vpack.c.bf16 %v463_v7, %v462_v9 }
 0x13f   :  { %570 = vmatpush.bf16.msra.mxu0 %v485_v57  ;;  %762 = vmatpush.bf16.msra.mxu2 %v485_v57 }
 0x140   :  { %763 = vmatpush.bf16.msra.mxu3 %v485_v57  ;;  %v367_v60 = vpop.permute.xlu1 %366 }
 0x141   :  { %v444_v41 = vadd.f32 %v367_v60, %v332_v2  ;;  %v508_v52 = vpop.permute.xlu2 %507 }
 0x143   :  { %v460_v6 = vmax.f32 %v444_v41, 0.0 }
 0x145   :  { %v484_v13 = vpack.c.bf16 %v461_v12, %v460_v6 }
 0x147   :  { %571 = vmatpush.bf16.msra.mxu0 %v484_v13  ;;  %764 = vmatpush.bf16.msra.mxu2 %v484_v13 }
 0x148   :  { %765 = vmatpush.bf16.msra.mxu3 %v484_v13  ;;  %v538_v16 = vpop.permute.xlu1 %537 }
 0x14a   :  { %572 = vmatmul.bf16.vlgmr.msra.gmra.mxu0 %v744_v3  ;;  %577 = vmatmul.bf16.vlgmr.msra.gmra.mxu2 %v745_v14  ;;  %v626_v5 = vpop.permute.xlu2 %625 }
 0x14b   :  { %582 = vmatmul.bf16.vlgmr.msra.gmra.mxu3 %v746_v15 }
 0x150   :  { %v528_v23 = vpop.permute.xlu1 %527 }
 0x152   :  { %v685_v60 = vpop.permute.xlu2 %684 }
 0x158   :  { %v503_v51 = vpop.permute.xlu1 %502 }
 0x15b   :  { %587 = vmatmul.bf16.gmra.mxu3 %v747_v8 }
 0x15f   :  { %v533_v19 = vpop.permute.xlu0 %532 }
 0x160   :  { %v621_v4 = vpop.permute.xlu1 %620 }
 0x167   :  { %v518_v37 = vpop.permute.xlu0 %517 }
 0x168   :  { %v680_v57 = vpop.permute.xlu1 %679 }
 0x170   :  { %v695_v1 = vpop.permute.xlu1 %694 }
 0x171   :  { %v616_v31 = vpop.permute.xlu0 %615 }
 0x18f   :  { %v631_v7 = vpop.permute.xlu0 %630 }
 0x197   :  { %v690_v63 = vpop.permute.xlu0 %689 }
 0x1c7   :  { %v573_v20 = vpop.f32.mrf.mxu0 }
 0x1c8   :  { %v574_v45 = vadd.f32 %v573_v20, %v503_v51 }
 0x1ca   :  { %v593_v55 = vmax.f32 %v574_v45, 0.0 }
 0x1cd   :  { %v578_v17 = vpop.f32.mrf.mxu2 }
 0x1ce   :  { %v583_v56 = vpop.f32.mrf.mxu3  ;;  %v579_v30 = vadd.f32 %v578_v17, %v513_v21 }
 0x1cf   :  { %v584_v26 = vadd.f32 %v583_v56, %v523_v49  ;;  %v575_v43 = vpop.f32.mrf.mxu0 }
 0x1d0   :  { %v576_v50 = vadd.f32 %v575_v43, %v508_v52  ;;  %v595_v34 = vmax.f32 %v579_v30, 0.0 }
 0x1d1   :  { %v597_v47 = vmax.f32 %v584_v26, 0.0 }
 0x1d2   :  { %v594_v48 = vmax.f32 %v576_v50, 0.0 }
 0x1d4   :  { %v605_v42 = vpack.c.bf16 %v594_v48, %v593_v55 }
 0x1d5   :  { %v580_v29 = vpop.f32.mrf.mxu2 }
 0x1d6   :  { %v585_v38 = vpop.f32.mrf.mxu3  ;;  %v581_v25 = vadd.f32 %v580_v29, %v518_v37 }
 0x1d7   :  { %v586_v59 = vadd.f32 %v585_v38, %v528_v23 }
 0x1d8   :  { %v596_v58 = vmax.f32 %v581_v25, 0.0 }
 0x1d9   :  { %v598_v39 = vmax.f32 %v586_v59, 0.0 }
 0x1da   :  { %v606_v54 = vpack.c.bf16 %v596_v58, %v595_v34 }
 0x1db   :  { %v607_v28 = vpack.c.bf16 %v598_v39, %v597_v47 }
 0x1de   :  { %v588_v18 = vpop.f32.mrf.mxu3 }
 0x1df   :  { %v589_v22 = vadd.f32 %v588_v18, %v533_v19  ;;  %v711_v19 = vstv %s1284_s9 }
 0x1e1   :  { %v599_v32 = vmax.f32 %v589_v22, 0.0 }
 0x1e6   :  { %v590_v24 = vpop.f32.mrf.mxu3 }
 0x1e7   :  { %v591_v33 = vadd.f32 %v590_v24, %v538_v16 }
 0x1e9   :  { %v600_v35 = vmax.f32 %v591_v33, 0.0 }
 0x1eb   :  { %v608_v40 = vpack.c.bf16 %v600_v35, %v599_v32 }
 0x1ed   :  { %654 = vmatpush.bf16.msra.mxu1 %v608_v40 }
 0x1f1   :  { %655 = vmatpush.bf16.msra.mxu1 %v607_v28 }
 0x1f5   :  { %656 = vmatpush.bf16.msra.mxu1 %v606_v54 }
 0x1f9   :  { %657 = vmatpush.bf16.msra.mxu1 %v605_v42 }
 0x1fc   :  { %742 = vmatmul.msk.bf16.vlgmr.msra.gmra.mxu1 %vm643_vm0, %v748_v61 }
 0x20c   :  { %743 = vmatmul.msk.bf16.gmra.mxu1 %vm643_vm0, %v749_v46 }
 0x279   :  { %v659_v0 = vpop.f32.mrf.mxu1 }
 0x27a   :  { %v660_v44 = vadd.f32 %v659_v0, %v616_v31 }
 0x27c   :  { %v669_v11 = vmax.f32 %v660_v44, 0.0 }
 0x27e   :  { %v697_v12 = vmul.f32 %v680_v57, %v669_v11 }
 0x281   :  { %v661_v36 = vpop.f32.mrf.mxu1 }
 0x282   :  { %v662_v53 = vadd.f32 %v661_v36, %v621_v4 }
 0x284   :  { %v670_v62 = vmax.f32 %v662_v53, 0.0 }
 0x286   :  { %v698_v41 = vmul.f32 %v685_v60, %v670_v62 }
 0x288   :  { %v701_v14 = vadd.f32 %v698_v41, %v697_v12 }
 0x289   :  { %v664_v9 = vpop.f32.mrf.mxu1 }
 0x28a   :  { %v665_v10 = vadd.f32 %v664_v9, %v626_v5 }
 0x28c   :  { %v671_v2 = vmax.f32 %v665_v10, 0.0 }
 0x28e   :  { %v699_v13 = vmul.f32 %v690_v63, %v671_v2 }
 0x290   :  { %v702_v27 = vadd.f32 %v701_v14, %v699_v13 }
 0x291   :  { %v666_v6 = vpop.f32.mrf.mxu1 }
 0x292   :  { %v667_v3 = vadd.f32 %v666_v6, %v631_v7 }
 0x294   :  { %v672_v15 = vmax.f32 %v667_v3, 0.0 }
 0x296   :  { %v700_v8 = vmul.f32 %v695_v1, %v672_v15 }
 0x298   :  { %v703_v56 = vadd.f32 %v702_v27, %v700_v8 }
 0x29a   :  { %v704_v38 = vrot.slane %v703_v56, 4 }
 0x29c   :  { %v705_v49 = vadd.f32 %v704_v38, %v703_v56 }
 0x29e   :  { %v706_v16 = vrot.slane %v705_v49, 2 }
 0x2a0   :  { %v707_v17 = vadd.f32 %v706_v16, %v705_v49 }
 0x2a2   :  { %v708_v18 = vrot.slane %v707_v17, 1 }
 0x2a4   :  { %v709_v20 = vadd.f32 %v708_v18, %v707_v17 }
 0x2a6   :  { %v712_v21 = vadd.f32 %v711_v19, %v709_v20 }
 0x2a8   :  { %713 = vst [vmem:[%s1285_s10] sm:$0x1] %v712_v21 }

</bundles_post_ra>
